<compile_context>
chip_gen: v6e
topology: v6e:2x2x1
jax: 0.10.0
libtpu: 0.0.40
codegen_flags: <defaults>
</compile_context>

<pallas_src>
import functools

import jax
import jax.numpy as jnp
from jax.experimental import pallas as pl
from jax.experimental.pallas import tpu as pltpu


def _fused_kernel(x_ref, w_ref, cb_ref, fcw_ref, fcb_ref,
                  feat_ref, pred_ref, xpad_ref, *, H, W, PAD):
    # x_ref   : (1, Cin, HW)            flattened input (lane-dense)
    # w_ref   : (9, Cout, Cin)          conv weight, tap-major (kh*3 + kw)
    # cb_ref  : (Cout, 1)               conv bias column
    # fcw_ref : (K, Cout)               fc weight (PyTorch (out, in) layout)
    # fcb_ref : (K, 1)                  fc bias column
    # feat_ref: (1, Cout, HW)           ReLU(conv) feature map (lane-dense)
    # pred_ref: (1, K, 1)               predictor output column
    # xpad_ref: (Cin, HW + 2*PAD)       VMEM scratch, halo-padded row
    HW = H * W
    Cin = x_ref.shape[1]
    Cout = feat_ref.shape[1]

    # Build the halo-padded row in VMEM: zeros on both sides so every
    # out-of-row conv tap reads 0.  Both stores are lane-aligned (PAD % 128 == 0).
    x0 = x_ref[0].astype(jnp.float32)                              # (Cin, HW)
    xpad_ref[...] = jnp.zeros_like(xpad_ref)
    xpad_ref[:, PAD:PAD + HW] = x0
    xp = xpad_ref[...]                                             # (Cin, HW + 2*PAD)

    # Column index of every flattened pixel.  Masks are only needed for the
    # dw = +-1 taps (column wrap into the neighbouring row); row over/underflow
    # already reads the zero halo.
    col = jax.lax.broadcasted_iota(jnp.int32, (Cin, HW), 1) % W
    ok_left = col >= 1                 # valid positions for a dw = -1 tap
    ok_right = col <= W - 2            # valid positions for a dw = +1 tap

    acc = jnp.zeros((Cout, HW), dtype=jnp.float32)
    for dh in (-1, 0, 1):
        for dw in (-1, 0, 1):
            t = (dh + 1) * 3 + (dw + 1)
            start = PAD + dh * W + dw
            tap = xp[:, start:start + HW]                          # (Cin, HW) shifted window
            if dw == -1:
                tap = jnp.where(ok_left, tap, 0.0)
            elif dw == 1:
                tap = jnp.where(ok_right, tap, 0.0)
            acc = acc + jnp.dot(w_ref[t].astype(jnp.float32), tap,
                                preferred_element_type=jnp.float32)

    feat = jnp.maximum(acc + cb_ref[...].astype(jnp.float32), 0.0)  # (Cout, HW)
    feat_ref[...] = feat[None].astype(feat_ref.dtype)

    # Fused global-average-pool + linear predictor head.
    pooled = jnp.sum(feat, axis=1, keepdims=True) * (1.0 / HW)      # (Cout, 1)
    pred = jnp.dot(fcw_ref[...].astype(jnp.float32), pooled,
                   preferred_element_type=jnp.float32)              # (K, 1)
    pred = pred + fcb_ref[...].astype(jnp.float32)
    pred_ref[...] = pred[None].astype(pred_ref.dtype)


def model_e_p_forward(x_nchw, params):
    """x_nchw: (B, Cin, H, W) f32.  Returns (predictor_out (B, K), feature_map NCHW)."""
    B, Cin, H, W = x_nchw.shape
    conv_w = params["conv_w"]          # (Cout, Cin, 3, 3)  PyTorch OIHW
    conv_b = params["conv_b"]          # (Cout,)
    fc_w = params["fc_w"]              # (K, Cout)          PyTorch Linear (out, in)
    fc_b = params["fc_b"]              # (K,)
    Cout = conv_w.shape[0]
    K = fc_w.shape[0]
    HW = H * W
    # Halo must cover the largest tap shift (W+1); round up to a lane-aligned size
    # so the in-kernel halo stores sit exactly on vreg boundaries.
    PAD = ((W + 1 + 127) // 128) * 128

    # Free reshape into the lane-dense layout (no transposes, no padded HBM copy).
    x_flat = x_nchw.reshape(B, Cin, HW)

    # O(100)-element weight re-layouts, negligible.
    w_taps = jnp.transpose(conv_w, (2, 3, 0, 1)).reshape(9, Cout, Cin)
    cb_col = conv_b.reshape(Cout, 1)
    fcb_col = fc_b.reshape(K, 1)

    kernel = functools.partial(_fused_kernel, H=H, W=W, PAD=PAD)
    feat_flat, pred_col = pl.pallas_call(
        kernel,
        out_shape=(
            jax.ShapeDtypeStruct((B, Cout, HW), jnp.float32),
            jax.ShapeDtypeStruct((B, K, 1), jnp.float32),
        ),
        grid_spec=pltpu.PrefetchScalarGridSpec(
            num_scalar_prefetch=0,
            grid=(B,),
            in_specs=[
                pl.BlockSpec((1, Cin, HW), lambda b: (b, 0, 0)),
                pl.BlockSpec((9, Cout, Cin), lambda b: (0, 0, 0)),
                pl.BlockSpec((Cout, 1), lambda b: (0, 0)),
                pl.BlockSpec((K, Cout), lambda b: (0, 0)),
                pl.BlockSpec((K, 1), lambda b: (0, 0)),
            ],
            out_specs=[
                pl.BlockSpec((1, Cout, HW), lambda b: (b, 0, 0)),
                pl.BlockSpec((1, K, 1), lambda b: (b, 0, 0)),
            ],
            scratch_shapes=[pltpu.VMEM((Cin, HW + 2 * PAD), jnp.float32)],
        ),
        compiler_params=pltpu.CompilerParams(
            dimension_semantics=("parallel",)),   # v7x: one batch element per TensorCore
    )(x_flat, w_taps, cb_col, fc_w, fcb_col)

    predictor_out = pred_col.reshape(B, K)
    extractor_out2 = feat_flat.reshape(B, Cout, H, W)   # already NCHW; free reshape
    return predictor_out, extractor_out2


def init_params(key, cin=4, chid=8, num_classes=10):
    k1, k2, k3, k4 = jax.random.split(key, 4)
    return {
        # PyTorch-convention layouts.
        "conv_w": jax.random.normal(k1, (chid, cin, 3, 3), jnp.float32) * 0.1,
        "conv_b": jax.random.normal(k2, (chid,), jnp.float32) * 0.1,
        "fc_w": jax.random.normal(k3, (num_classes, chid), jnp.float32) * 0.1,
        "fc_b": jax.random.normal(k4, (num_classes,), jnp.float32) * 0.1,
    }


def _reference_forward(x_nchw, params):
    """Plain-XLA reference for a structural correctness check."""
    feat = jax.lax.conv_general_dilated(
        x_nchw, params["conv_w"], window_strides=(1, 1),
        padding=((1, 1), (1, 1)),
        dimension_numbers=("NCHW", "OIHW", "NCHW"),
        precision=jax.lax.Precision.HIGHEST)
    feat = jnp.maximum(feat + params["conv_b"][None, :, None, None], 0.0)
    pooled = jnp.mean(feat, axis=(2, 3))
    pred = pooled @ params["fc_w"].T + params["fc_b"]
    return pred, feat


if __name__ == "__main__":
    key = jax.random.PRNGKey(0)
    kx, kp = jax.random.split(key)

    B, Cin, H, W = 2, 4, 16, 16
    Chid, K = 8, 10
    x = jax.random.normal(kx, (B, Cin, H, W), jnp.float32)
    params = init_params(kp, cin=Cin, chid=Chid, num_classes=K)

    pred_out, extr_out2 = jax.jit(model_e_p_forward)(x, params)
    jax.block_until_ready((pred_out, extr_out2))

    assert pred_out.shape == (B, K)
    assert extr_out2.shape == (B, Chid, H, W)

    # Structural correctness check (loose tolerance: default f32 matmul/conv
    # precision on the MXU is ~bf16-level; structural bugs would be O(0.1+)).
    ref_pred, ref_feat = _reference_forward(x, params)
    assert jnp.allclose(extr_out2, ref_feat, rtol=0.0, atol=5e-2), \
        float(jnp.max(jnp.abs(extr_out2 - ref_feat)))
    assert jnp.allclose(pred_out, ref_pred, rtol=0.0, atol=5e-2), \
        float(jnp.max(jnp.abs(pred_out - ref_pred)))

    print("KERNEL_OK")
</pallas_src>

<mosaic_0001>
module attributes {stable_mosaic.version = 11 : i64} {
  func.func @_fused_kernel(%arg0: i32, %arg1: memref<1x4x256xf32, #tpu.memory_space<vmem>>, %arg2: memref<9x8x4xf32, #tpu.memory_space<vmem>>, %arg3: memref<8x1xf32, #tpu.memory_space<vmem>>, %arg4: memref<10x8xf32, #tpu.memory_space<vmem>>, %arg5: memref<10x1xf32, #tpu.memory_space<vmem>>, %arg6: memref<1x8x256xf32, #tpu.memory_space<vmem>>, %arg7: memref<1x10x1xf32, #tpu.memory_space<vmem>>, %arg8: memref<4x512xf32, #tpu.memory_space<vmem>>) attributes {dimension_semantics = [#tpu.dimension_semantics<parallel>], iteration_bounds = array<i64: 2>, scalar_prefetch = 0 : i64, scratch_operands = 1 : i64, tpu.core_type = #tpu.core_type<tc>, window_params = [{transform_indices = @transform_0, window_bounds = array<i64: 1, 4, 256>}, {pipeline_mode = #tpu.pipeline_mode<synchronous>, transform_indices = @transform_1, window_bounds = array<i64: 9, 8, 4>}, {pipeline_mode = #tpu.pipeline_mode<synchronous>, transform_indices = @transform_2, window_bounds = array<i64: 8, 1>}, {pipeline_mode = #tpu.pipeline_mode<synchronous>, transform_indices = @transform_3, window_bounds = array<i64: 10, 8>}, {pipeline_mode = #tpu.pipeline_mode<synchronous>, transform_indices = @transform_4, window_bounds = array<i64: 10, 1>}, {transform_indices = @transform_5, window_bounds = array<i64: 1, 8, 256>}, {transform_indices = @transform_6, window_bounds = array<i64: 1, 10, 1>}]} {
    %c0 = arith.constant 0 : index
    %c0_0 = arith.constant 0 : index
    %c0_1 = arith.constant 0 : index
    %0 = vector.load %arg1[%c0, %c0_0, %c0_1] : memref<1x4x256xf32, #tpu.memory_space<vmem>>, vector<1x4x256xf32>
    %1 = vector.shape_cast %0 : vector<1x4x256xf32> to vector<4x256xf32>
    %cst = arith.constant 0.000000e+00 : f32
    %2 = vector.broadcast %cst : f32 to vector<4x512xf32>
    %c0_2 = arith.constant 0 : index
    %c0_3 = arith.constant 0 : index
    %3 = vector.load %arg8[%c0_2, %c0_3] : memref<4x512xf32, #tpu.memory_space<vmem>>, vector<4x512xf32>
    tpu.vector_store %arg8[%c0_2, %c0_3], %2 {strides = array<i32>} : memref<4x512xf32, #tpu.memory_space<vmem>>, vector<4x512xf32>,
    %c0_4 = arith.constant 0 : index
    %c128 = arith.constant 128 : index
    %4 = vector.load %arg8[%c0_4, %c128] : memref<4x512xf32, #tpu.memory_space<vmem>>, vector<4x256xf32>
    tpu.vector_store %arg8[%c0_4, %c128], %1 {strides = array<i32>} : memref<4x512xf32, #tpu.memory_space<vmem>>, vector<4x256xf32>,
    %c0_5 = arith.constant 0 : index
    %c0_6 = arith.constant 0 : index
    %5 = vector.load %arg8[%c0_5, %c0_6] : memref<4x512xf32, #tpu.memory_space<vmem>>, vector<4x512xf32>
    %6 = tpu.iota {dimensions = array<i32: 1>} : vector<4x256xi32>
    %c16_i32 = arith.constant 16 : i32
    %c0_i32 = arith.constant 0 : i32
    %7 = arith.cmpi eq, %c16_i32, %c0_i32 : i32
    %c1_i32 = arith.constant 1 : i32
    %8 = arith.select %7, %c1_i32, %c16_i32 : i32
    %9 = vector.broadcast %8 : i32 to vector<4x256xi32>
    %10 = arith.remsi %6, %9 : vector<4x256xi32>
    %c0_i32_7 = arith.constant 0 : i32
    %11 = vector.broadcast %c0_i32_7 : i32 to vector<4x256xi32>
    %12 = arith.cmpi ne, %10, %11 : vector<4x256xi32>
    %c0_i32_8 = arith.constant 0 : i32
    %13 = vector.broadcast %c0_i32_8 : i32 to vector<4x256xi32>
    %14 = arith.cmpi slt, %10, %13 : vector<4x256xi32>
    %c0_i32_9 = arith.constant 0 : i32
    %15 = arith.cmpi slt, %8, %c0_i32_9 : i32
    %16 = vector.broadcast %15 : i1 to vector<4x256xi1>
    %17 = vector.broadcast %16 : vector<4x256xi1> to vector<4x256xi1>
    %18 = arith.xori %14, %17 : vector<4x256xi1>
    %19 = arith.andi %18, %12 : vector<4x256xi1>
    %20 = vector.broadcast %8 : i32 to vector<4x256xi32>
    %21 = arith.addi %10, %20 : vector<4x256xi32>
    %22 = arith.select %19, %21, %10 : vector<4x256xi1>, vector<4x256xi32>
    %c1_i32_10 = arith.constant 1 : i32
    %23 = vector.broadcast %c1_i32_10 : i32 to vector<4x256xi32>
    %24 = arith.cmpi sge, %22, %23 : vector<4x256xi32>
    %c14_i32 = arith.constant 14 : i32
    %25 = vector.broadcast %c14_i32 : i32 to vector<4x256xi32>
    %26 = arith.cmpi sle, %22, %25 : vector<4x256xi32>
    %cst_11 = arith.constant 0.000000e+00 : f32
    %27 = vector.broadcast %cst_11 : f32 to vector<8x256xf32>
    %28 = vector.extract_strided_slice %5 {offsets = [0, 111], sizes = [4, 256], strides = [1, 1]} : vector<4x512xf32> to vector<4x256xf32>
    %cst_12 = arith.constant 0.000000e+00 : f32
    %29 = vector.broadcast %cst_12 : f32 to vector<4x256xf32>
    %30 = arith.select %24, %28, %29 : vector<4x256xi1>, vector<4x256xf32>
    %c0_13 = arith.constant 0 : index
    %c0_14 = arith.constant 0 : index
    %c0_15 = arith.constant 0 : index
    %31 = vector.load %arg2[%c0_13, %c0_14, %c0_15] : memref<9x8x4xf32, #tpu.memory_space<vmem>>, vector<1x8x4xf32>
    %32 = vector.shape_cast %31 : vector<1x8x4xf32> to vector<8x4xf32>
    %cst_16 = arith.constant dense<0.000000e+00> : vector<8x256xf32>
    %33 = tpu.matmul %32, %30, %cst_16 {dimension_numbers = #tpu.dot_dimension_numbers<[1], [0], [0], [1], [0, 0, 1, 1], [], []>} : vector<8x4xf32>, vector<4x256xf32>, vector<8x256xf32> -> vector<8x256xf32>
    %34 = arith.addf %27, %33 : vector<8x256xf32>
    %35 = vector.extract_strided_slice %5 {offsets = [0, 112], sizes = [4, 256], strides = [1, 1]} : vector<4x512xf32> to vector<4x256xf32>
    %c1 = arith.constant 1 : index
    %c0_17 = arith.constant 0 : index
    %c0_18 = arith.constant 0 : index
    %36 = vector.load %arg2[%c1, %c0_17, %c0_18] : memref<9x8x4xf32, #tpu.memory_space<vmem>>, vector<1x8x4xf32>
    %37 = vector.shape_cast %36 : vector<1x8x4xf32> to vector<8x4xf32>
    %cst_19 = arith.constant dense<0.000000e+00> : vector<8x256xf32>
    %38 = tpu.matmul %37, %35, %cst_19 {dimension_numbers = #tpu.dot_dimension_numbers<[1], [0], [0], [1], [0, 0, 1, 1], [], []>} : vector<8x4xf32>, vector<4x256xf32>, vector<8x256xf32> -> vector<8x256xf32>
    %39 = arith.addf %34, %38 : vector<8x256xf32>
    %40 = vector.extract_strided_slice %5 {offsets = [0, 113], sizes = [4, 256], strides = [1, 1]} : vector<4x512xf32> to vector<4x256xf32>
    %cst_20 = arith.constant 0.000000e+00 : f32
    %41 = vector.broadcast %cst_20 : f32 to vector<4x256xf32>
    %42 = arith.select %26, %40, %41 : vector<4x256xi1>, vector<4x256xf32>
    %c2 = arith.constant 2 : index
    %c0_21 = arith.constant 0 : index
    %c0_22 = arith.constant 0 : index
    %43 = vector.load %arg2[%c2, %c0_21, %c0_22] : memref<9x8x4xf32, #tpu.memory_space<vmem>>, vector<1x8x4xf32>
    %44 = vector.shape_cast %43 : vector<1x8x4xf32> to vector<8x4xf32>
    %cst_23 = arith.constant dense<0.000000e+00> : vector<8x256xf32>
    %45 = tpu.matmul %44, %42, %cst_23 {dimension_numbers = #tpu.dot_dimension_numbers<[1], [0], [0], [1], [0, 0, 1, 1], [], []>} : vector<8x4xf32>, vector<4x256xf32>, vector<8x256xf32> -> vector<8x256xf32>
    %46 = arith.addf %39, %45 : vector<8x256xf32>
    %47 = vector.extract_strided_slice %5 {offsets = [0, 127], sizes = [4, 256], strides = [1, 1]} : vector<4x512xf32> to vector<4x256xf32>
    %cst_24 = arith.constant 0.000000e+00 : f32
    %48 = vector.broadcast %cst_24 : f32 to vector<4x256xf32>
    %49 = arith.select %24, %47, %48 : vector<4x256xi1>, vector<4x256xf32>
    %c3 = arith.constant 3 : index
    %c0_25 = arith.constant 0 : index
    %c0_26 = arith.constant 0 : index
    %50 = vector.load %arg2[%c3, %c0_25, %c0_26] : memref<9x8x4xf32, #tpu.memory_space<vmem>>, vector<1x8x4xf32>
    %51 = vector.shape_cast %50 : vector<1x8x4xf32> to vector<8x4xf32>
    %cst_27 = arith.constant dense<0.000000e+00> : vector<8x256xf32>
    %52 = tpu.matmul %51, %49, %cst_27 {dimension_numbers = #tpu.dot_dimension_numbers<[1], [0], [0], [1], [0, 0, 1, 1], [], []>} : vector<8x4xf32>, vector<4x256xf32>, vector<8x256xf32> -> vector<8x256xf32>
    %53 = arith.addf %46, %52 : vector<8x256xf32>
    %54 = vector.extract_strided_slice %5 {offsets = [0, 128], sizes = [4, 256], strides = [1, 1]} : vector<4x512xf32> to vector<4x256xf32>
    %c4 = arith.constant 4 : index
    %c0_28 = arith.constant 0 : index
    %c0_29 = arith.constant 0 : index
    %55 = vector.load %arg2[%c4, %c0_28, %c0_29] : memref<9x8x4xf32, #tpu.memory_space<vmem>>, vector<1x8x4xf32>
    %56 = vector.shape_cast %55 : vector<1x8x4xf32> to vector<8x4xf32>
    %cst_30 = arith.constant dense<0.000000e+00> : vector<8x256xf32>
    %57 = tpu.matmul %56, %54, %cst_30 {dimension_numbers = #tpu.dot_dimension_numbers<[1], [0], [0], [1], [0, 0, 1, 1], [], []>} : vector<8x4xf32>, vector<4x256xf32>, vector<8x256xf32> -> vector<8x256xf32>
    %58 = arith.addf %53, %57 : vector<8x256xf32>
    %59 = vector.extract_strided_slice %5 {offsets = [0, 129], sizes = [4, 256], strides = [1, 1]} : vector<4x512xf32> to vector<4x256xf32>
    %cst_31 = arith.constant 0.000000e+00 : f32
    %60 = vector.broadcast %cst_31 : f32 to vector<4x256xf32>
    %61 = arith.select %26, %59, %60 : vector<4x256xi1>, vector<4x256xf32>
    %c5 = arith.constant 5 : index
    %c0_32 = arith.constant 0 : index
    %c0_33 = arith.constant 0 : index
    %62 = vector.load %arg2[%c5, %c0_32, %c0_33] : memref<9x8x4xf32, #tpu.memory_space<vmem>>, vector<1x8x4xf32>
    %63 = vector.shape_cast %62 : vector<1x8x4xf32> to vector<8x4xf32>
    %cst_34 = arith.constant dense<0.000000e+00> : vector<8x256xf32>
    %64 = tpu.matmul %63, %61, %cst_34 {dimension_numbers = #tpu.dot_dimension_numbers<[1], [0], [0], [1], [0, 0, 1, 1], [], []>} : vector<8x4xf32>, vector<4x256xf32>, vector<8x256xf32> -> vector<8x256xf32>
    %65 = arith.addf %58, %64 : vector<8x256xf32>
    %66 = vector.extract_strided_slice %5 {offsets = [0, 143], sizes = [4, 256], strides = [1, 1]} : vector<4x512xf32> to vector<4x256xf32>
    %cst_35 = arith.constant 0.000000e+00 : f32
    %67 = vector.broadcast %cst_35 : f32 to vector<4x256xf32>
    %68 = arith.select %24, %66, %67 : vector<4x256xi1>, vector<4x256xf32>
    %c6 = arith.constant 6 : index
    %c0_36 = arith.constant 0 : index
    %c0_37 = arith.constant 0 : index
    %69 = vector.load %arg2[%c6, %c0_36, %c0_37] : memref<9x8x4xf32, #tpu.memory_space<vmem>>, vector<1x8x4xf32>
    %70 = vector.shape_cast %69 : vector<1x8x4xf32> to vector<8x4xf32>
    %cst_38 = arith.constant dense<0.000000e+00> : vector<8x256xf32>
    %71 = tpu.matmul %70, %68, %cst_38 {dimension_numbers = #tpu.dot_dimension_numbers<[1], [0], [0], [1], [0, 0, 1, 1], [], []>} : vector<8x4xf32>, vector<4x256xf32>, vector<8x256xf32> -> vector<8x256xf32>
    %72 = arith.addf %65, %71 : vector<8x256xf32>
    %73 = vector.extract_strided_slice %5 {offsets = [0, 144], sizes = [4, 256], strides = [1, 1]} : vector<4x512xf32> to vector<4x256xf32>
    %c7 = arith.constant 7 : index
    %c0_39 = arith.constant 0 : index
    %c0_40 = arith.constant 0 : index
    %74 = vector.load %arg2[%c7, %c0_39, %c0_40] : memref<9x8x4xf32, #tpu.memory_space<vmem>>, vector<1x8x4xf32>
    %75 = vector.shape_cast %74 : vector<1x8x4xf32> to vector<8x4xf32>
    %cst_41 = arith.constant dense<0.000000e+00> : vector<8x256xf32>
    %76 = tpu.matmul %75, %73, %cst_41 {dimension_numbers = #tpu.dot_dimension_numbers<[1], [0], [0], [1], [0, 0, 1, 1], [], []>} : vector<8x4xf32>, vector<4x256xf32>, vector<8x256xf32> -> vector<8x256xf32>
    %77 = arith.addf %72, %76 : vector<8x256xf32>
    %78 = vector.extract_strided_slice %5 {offsets = [0, 145], sizes = [4, 256], strides = [1, 1]} : vector<4x512xf32> to vector<4x256xf32>
    %cst_42 = arith.constant 0.000000e+00 : f32
    %79 = vector.broadcast %cst_42 : f32 to vector<4x256xf32>
    %80 = arith.select %26, %78, %79 : vector<4x256xi1>, vector<4x256xf32>
    %c8 = arith.constant 8 : index
    %c0_43 = arith.constant 0 : index
    %c0_44 = arith.constant 0 : index
    %81 = vector.load %arg2[%c8, %c0_43, %c0_44] : memref<9x8x4xf32, #tpu.memory_space<vmem>>, vector<1x8x4xf32>
    %82 = vector.shape_cast %81 : vector<1x8x4xf32> to vector<8x4xf32>
    %cst_45 = arith.constant dense<0.000000e+00> : vector<8x256xf32>
    %83 = tpu.matmul %82, %80, %cst_45 {dimension_numbers = #tpu.dot_dimension_numbers<[1], [0], [0], [1], [0, 0, 1, 1], [], []>} : vector<8x4xf32>, vector<4x256xf32>, vector<8x256xf32> -> vector<8x256xf32>
    %84 = arith.addf %77, %83 : vector<8x256xf32>
    %c0_46 = arith.constant 0 : index
    %c0_47 = arith.constant 0 : index
    %85 = vector.load %arg3[%c0_46, %c0_47] : memref<8x1xf32, #tpu.memory_space<vmem>>, vector<8x1xf32>
    %86 = vector.broadcast %85 : vector<8x1xf32> to vector<8x256xf32>
    %87 = arith.addf %84, %86 : vector<8x256xf32>
    %cst_48 = arith.constant 0.000000e+00 : f32
    %88 = vector.broadcast %cst_48 : f32 to vector<8x256xf32>
    %89 = arith.maximumf %87, %88 : vector<8x256xf32>
    %90 = vector.shape_cast %89 : vector<8x256xf32> to vector<1x8x256xf32>
    %c0_49 = arith.constant 0 : index
    %c0_50 = arith.constant 0 : index
    %c0_51 = arith.constant 0 : index
    %91 = vector.load %arg6[%c0_49, %c0_50, %c0_51] : memref<1x8x256xf32, #tpu.memory_space<vmem>>, vector<1x8x256xf32>
    tpu.vector_store %arg6[%c0_49, %c0_50, %c0_51], %90 {strides = array<i32>} : memref<1x8x256xf32, #tpu.memory_space<vmem>>, vector<1x8x256xf32>,
    %cst_52 = arith.constant dense<0.000000e+00> : vector<8xf32>
    %92 = vector.multi_reduction <add>, %89, %cst_52 [1] : vector<8x256xf32> to vector<8xf32>
    %93 = vector.shape_cast %92 : vector<8xf32> to vector<8x1xf32>
    %cst_53 = arith.constant 3.906250e-03 : f32
    %94 = vector.broadcast %cst_53 : f32 to vector<8x1xf32>
    %95 = arith.mulf %93, %94 : vector<8x1xf32>
    %c0_54 = arith.constant 0 : index
    %c0_55 = arith.constant 0 : index
    %96 = vector.load %arg4[%c0_54, %c0_55] : memref<10x8xf32, #tpu.memory_space<vmem>>, vector<10x8xf32>
    %cst_56 = arith.constant dense<0.000000e+00> : vector<10x1xf32>
    %97 = tpu.matmul %96, %95, %cst_56 {dimension_numbers = #tpu.dot_dimension_numbers<[1], [0], [0], [1], [0, 0, 1, 1], [], []>} : vector<10x8xf32>, vector<8x1xf32>, vector<10x1xf32> -> vector<10x1xf32>
    %c0_57 = arith.constant 0 : index
    %c0_58 = arith.constant 0 : index
    %98 = vector.load %arg5[%c0_57, %c0_58] : memref<10x1xf32, #tpu.memory_space<vmem>>, vector<10x1xf32>
    %99 = arith.addf %97, %98 : vector<10x1xf32>
    %100 = vector.shape_cast %99 : vector<10x1xf32> to vector<1x10x1xf32>
    %c0_59 = arith.constant 0 : index
    %c0_60 = arith.constant 0 : index
    %c0_61 = arith.constant 0 : index
    %101 = vector.load %arg7[%c0_59, %c0_60, %c0_61] : memref<1x10x1xf32, #tpu.memory_space<vmem>>, vector<1x10x1xf32>
    tpu.vector_store %arg7[%c0_59, %c0_60, %c0_61], %100 {strides = array<i32>} : memref<1x10x1xf32, #tpu.memory_space<vmem>>, vector<1x10x1xf32>,
    return
  }
  func.func @transform_0(%arg0: i32) -> (i32, i32, i32) {
    %c0_i32 = arith.constant 0 : i32
    %c0_i32_0 = arith.constant 0 : i32
    %c0_i32_1 = arith.constant 0 : i32
    return %arg0, %c0_i32, %c0_i32_0 : i32, i32, i32
  }
  func.func @transform_1(%arg0: i32) -> (i32, i32, i32) {
    %c0_i32 = arith.constant 0 : i32
    %c0_i32_0 = arith.constant 0 : i32
    %c0_i32_1 = arith.constant 0 : i32
    %c0_i32_2 = arith.constant 0 : i32
    return %c0_i32, %c0_i32_0, %c0_i32_1 : i32, i32, i32
  }
  func.func @transform_2(%arg0: i32) -> (i32, i32) {
    %c0_i32 = arith.constant 0 : i32
    %c0_i32_0 = arith.constant 0 : i32
    %c0_i32_1 = arith.constant 0 : i32
    return %c0_i32, %c0_i32_0 : i32, i32
  }
  func.func @transform_3(%arg0: i32) -> (i32, i32) {
    %c0_i32 = arith.constant 0 : i32
    %c0_i32_0 = arith.constant 0 : i32
    %c0_i32_1 = arith.constant 0 : i32
    return %c0_i32, %c0_i32_0 : i32, i32
  }
  func.func @transform_4(%arg0: i32) -> (i32, i32) {
    %c0_i32 = arith.constant 0 : i32
    %c0_i32_0 = arith.constant 0 : i32
    %c0_i32_1 = arith.constant 0 : i32
    return %c0_i32, %c0_i32_0 : i32, i32
  }
  func.func @transform_5(%arg0: i32) -> (i32, i32, i32) {
    %c0_i32 = arith.constant 0 : i32
    %c0_i32_0 = arith.constant 0 : i32
    %c0_i32_1 = arith.constant 0 : i32
    return %arg0, %c0_i32, %c0_i32_0 : i32, i32, i32
  }
  func.func @transform_6(%arg0: i32) -> (i32, i32, i32) {
    %c0_i32 = arith.constant 0 : i32
    %c0_i32_0 = arith.constant 0 : i32
    %c0_i32_1 = arith.constant 0 : i32
    return %arg0, %c0_i32, %c0_i32_0 : i32, i32, i32
  }
}

</mosaic_0001>

<bundles_post_ra>
// kernel: model_e_p_forward.1
= control target key start
LH: loop header
LB: loop body
LE: loop exit
PB: predicated region body
PF: predicated region fallthrough
CT: control target
= control target key end

     0   :  { %s1477_s21 = smov 0   ;;  %s1650_s0 = inlined_call_operand.vmem [shape: f32[2,4,256], index: 0, kind: input, shape index: {}]   ;;  %s1651_s1 = inlined_call_operand.vmem [shape: f32[9,8,4], index: 1, kind: input, shape index: {}]   ;;  %s1652_s2 = inlined_call_operand.vmem [shape: f32[8,1], index: 2, kind: input, shape index: {}]   ;;  %s1653_s3 = inlined_call_operand.vmem [shape: f32[10,8], index: 3, kind: input, shape index: {}]   ;;  %s1654_s4 = inlined_call_operand.vmem [shape: f32[10,1], index: 4, kind: input, shape index: {}]   ;;  %s1655_s5 = inlined_call_operand.vmem [shape: f32[2,8,256], index: 5, kind: output, shape index: {0}]   ;;  %s1656_s6 = inlined_call_operand.vmem [shape: f32[2,10,1], index: 6, kind: output, shape index: {1}]  }
   0x1 LB: > { %s1342_s22 = sadd.s32 4294967295, %s1430_s21   ;;  %p1346_p0 = scmp.ge.s32.totalorder %s1430_s21, 1  ;;  %s1430_s21 = sphi %s1477_s21, %s17_s21  }
   0x2   : > { %p215_p1 = scmp.lt.s32.totalorder %s1430_s21, 3 }
   0x4   : > { %p216_p2 = pnand %p1346_p0, %p215_p1 }
   0x5   : > { %p250_p3 = scmp.lt.s32.totalorder (!%p216_p2), %s1342_s22, 1  ;;  %s1433_s27 = smov (!%p216_p2), 17  }
   0x6   : > { %219 = sbr.rel (%p216_p2) target bundleno = 729 (0x2d9), region = 40  ;;  %s1434_s28 = smov (!%p216_p2), 16  }
   0x7   : > { %s1435_s29 = smov (!%p216_p2), 15   ;;  %s1436_s30 = smov (!%p216_p2), 1  }
   0x8   : > { %s1437_s7 = smov (!%p216_p2), 127   ;;  %s1438_s8 = smov (!%p216_p2), 113  }
   0x9   : > { %s1439_s9 = smov (!%p216_p2), 112   ;;  %s1441_s10 = smov (!%p216_p2), 111  }
   0xb   : > { %v1432_v0 = vmov 0.0   ;;  %s1666_s22 = smov (!%p250_p3, %s1342_s22), 1  ;;  %v1440_v6 = vmov 0   ;;  %v1149_v7 = vld [vmem:[%s1652_s2] sm:$0xff]  ;;  %v271_v8 = vlaneseq  ;;  %vm311_vm0 = vcmask 138240   ;;  %v1353_v27 = vld [vmem:[%s1651_s1 + $0x8] sm:$0xff] }
   0xc   : > { %266 = vst [vmem:[#allocation2] sm:$0xff] %v1432_v0  ;;  %267 = vst [vmem:[#allocation2 + $0x8] sm:$0xff] %v1432_v0  ;;  %403 = vmatprep.mubr.f32.mxu0 %v1432_v0  ;;  %483 = vmatprep.mubr.f32.mxu1 %v1432_v0  ;;  %s1392_s23 = sshll.u32 %s1666_s22, 3  ;;  %vm327_vm1 = vcmask 130048   ;;  %vm334_vm2 = vcmask 1043456   ;;  %vm330_vm5 = vcmask 31744  }
   0xd   : > { %s254_s26 = scalar_lea.vmem %s1650_s0, %s1392_s23  ;;  %1421 = vset.pattern.permute.xlu0 %v1440_v6  ;;  %v272_v9 = vand.u32 127, %v271_v8  ;;  %vm496_vm6 = vcmask 121856   ;;  %v318_v30 = vld [vmem:[%s1651_s1] sm:$0xff]  ;;  %vm593_vm9 = vcmask 7168   ;;  %v1360_v39 = vld [vmem:[%s1651_s1 + $0x10] sm:$0xff]  ;;  %vm773_vm10 = vcmask 1039360  }
   0xe   : > { %v265_v1 = vld [vmem:[%s254_s26] sm:$0xff]  ;;  %v1364_v46 = vld [vmem:[%s1651_s1 + $0x18] sm:$0xff]  ;;  %v1372_v55 = vld [vmem:[%s1651_s1 + $0x28] sm:$0xff]  ;;  %vm870_vm11 = vcmask 924672   ;;  %vm969_vm12 = vcmask 916480   ;;  %vm1058_vm13 = vcmask 908288  }
   0xf   : > { %268 = vst [vmem:[#allocation2 + $0x4] sm:$0xff] %v265_v1  ;;  %v273_v12 = vadd.s32 128, %v272_v9  ;;  %v278_v16 = vand.u32 15, %v272_v9  ;;  %v1368_v47 = vld [vmem:[%s1651_s1 + $0x20] sm:$0xff]  ;;  %v1376_v63 = vld [vmem:[%s1651_s1 + $0x30] sm:$0xff]  ;;  %v1380_v6 = vld [vmem:[%s1651_s1 + $0x38] sm:$0xff] }
  0x10   : > { %vm1169_vm14 = vcmask 64512   ;;  %vm1252_vm15 = vcmask 1024  }
  0x11   : > { %v285_v15 = vand.u32 15, %v273_v12  ;;  %vm1524_vm4 = vcmp.ge.s32.totalorder %v278_v16, 1  ;;  %vm1541_vm7 = vcmp.le.s32.totalorder %v278_v16, 14 }
  0x13   : > { %vm1520_vm3 = vcmp.ge.s32.totalorder %v285_v15, 1  ;;  %vm1545_vm8 = vcmp.le.s32.totalorder %v285_v15, 14 }
  0x16   : > { %v1495_v2 = vld [vmem:[#allocation2 + $0x8] sm:$0xff]  ;;  %v269_v3 = vld [vmem:[#allocation2] sm:$0xff] }
  0x17   : > { %309 = vrot.lane.b32.xlu1 %v1495_v2, %s1433_s27  ;;  %325 = vrot.lane.b32.xlu0 %v1495_v2, %s1434_s28  ;;  %v1499_v4 = vcombine.high %v269_v3, %v269_v3  ;;  %v766_v5 = vcombine.high %v1495_v2, %v1495_v2 }
  0x1b   : > { %305 = vrot.lane.b32.xlu1 %v269_v3, %s1433_s27  ;;  %321 = vrot.lane.b32.xlu0 %v269_v3, %s1434_s28 }
  0x1f   : > { %494 = vrot.lane.b32.xlu1 %v1495_v2, %s1435_s29  ;;  %490 = vrot.lane.b32.xlu0 %v269_v3, %s1435_s29 }
  0x23   : > { %307 = vrot.lane.b32.xlu1 %v1499_v4, %s1433_s27  ;;  %323 = vrot.lane.b32.xlu0 %v1499_v4, %s1434_s28 }
  0x27   : > { %589 = vrot.lane.b32.xlu1 %v1499_v4, %s1436_s30  ;;  %492 = vrot.lane.b32.xlu0 %v1499_v4, %s1435_s29 }
  0x2b   : > { %587 = vrot.lane.b32.xlu1 %v269_v3, %s1436_s30  ;;  %591 = vrot.lane.b32.xlu0 %v1495_v2, %s1436_s30 }
  0x2f   : > { %771 = vrot.lane.b32.xlu1 %v766_v5, %s1437_s7  ;;  %769 = vrot.lane.b32.xlu0 %v1495_v2, %s1437_s7 }
  0x33   : > { %866 = vrot.lane.b32.xlu1 %v1495_v2, %s1438_s8  ;;  %767 = vrot.lane.b32.xlu0 %v1499_v4, %s1437_s7 }
  0x37   : > { %864 = vrot.lane.b32.xlu1 %v1499_v4, %s1438_s8  ;;  %868 = vrot.lane.b32.xlu0 %v766_v5, %s1438_s8 }
  0x3b   : > { %967 = vrot.lane.b32.xlu1 %v766_v5, %s1439_s9  ;;  %965 = vrot.lane.b32.xlu0 %v1495_v2, %s1439_s9 }
  0x3f   : > { %1054 = vrot.lane.b32.xlu1 %v1495_v2, %s1441_s10  ;;  %963 = vrot.lane.b32.xlu0 %v1499_v4, %s1439_s9  ;;  %s1393_s9 = sshll.u32 %s1666_s22, 4 }
  0x40   : > { %s259_s12 = scalar_lea.vmem %s1655_s5, %s1393_s9  ;;  %s264_s20 = scalar_lea.vmem %s1656_s6, %s1393_s9 }
  0x43   : > { %1052 = vrot.lane.b32.xlu1 %v1499_v4, %s1441_s10  ;;  %1056 = vrot.lane.b32.xlu0 %v766_v5, %s1441_s10 }
  0x47   : > { %1152 = vperm.xlu0 %1421, %v1149_v7  }
  0x89   : > { %v310_v10 = vpop.permute.xlu1 %309  ;;  %v326_v11 = vpop.permute.xlu0 %325 }
  0x8d   : > { %v306_v13 = vpop.permute.xlu1 %305  ;;  %v322_v14 = vpop.permute.xlu0 %321 }
  0x91   : > { %v495_v17 = vpop.permute.xlu1 %494  ;;  %v491_v18 = vpop.permute.xlu0 %490 }
  0x95   : > { %v308_v21 = vpop.permute.xlu1 %307  ;;  %v324_v22 = vpop.permute.xlu0 %323 }
  0x96   : > { %v312_v23 = vsel %vm311_vm0, %v306_v13, %v308_v21  ;;  %v329_v24 = vsel %vm327_vm1, %v324_v22, %v326_v11  ;;  %v328_v25 = vsel %vm327_vm1, %v322_v14, %v324_v22  ;;  %v313_v26 = vsel %vm311_vm0, %v308_v21, %v310_v10  ;;  %v1384_v13 = vld [vmem:[%s1651_s1 + $0x40] sm:$0xff] }
  0x97   : > { %1354 = vmatprep.subr.msk.mxu0 %vm334_vm2, %v329_v24  ;;  %v317_v28 = vsel %vm1520_vm3, %v313_v26, 0.0  ;;  %v316_v29 = vsel %vm1524_vm4, %v312_v23, 0.0 }
  0x98   : > { %1355 = vmatpush1.msk.msra.mxu0 %vm334_vm2, %v328_v25  ;;  %1357 = vmatprep.subr.msk.mxu1 %vm334_vm2, %v317_v28 }
  0x99   : > { %1358 = vmatpush1.msk.msra.mxu1 %vm334_vm2, %v316_v29  ;;  %v590_v33 = vpop.permute.xlu1 %589  ;;  %v493_v34 = vpop.permute.xlu0 %492  ;;  %1356 = vmatmul.mubr.msk.f32.vlgmr.msra.gmra.mxu0 %vm330_vm5, %v1353_v27 }
  0x9a   : > { %v497_v35 = vsel %vm496_vm6, %v491_v18, %v493_v34  ;;  %v498_v36 = vsel %vm496_vm6, %v493_v34, %v495_v17  ;;  %1359 = vmatmul.mubr.msk.f32.vlgmr.msra.gmra.mxu1 %vm330_vm5, %v318_v30  ;;  %578 = vmatprep.mubr.f32.mxu0 %v1432_v0 }
  0x9b   : > { %v501_v37 = vsel %vm1541_vm7, %v497_v35, 0.0  ;;  %v502_v38 = vsel %vm1545_vm8, %v498_v36, 0.0  ;;  %675 = vmatprep.mubr.f32.mxu1 %v1432_v0 }
  0x9c   : > { %1361 = vmatprep.subr.msk.mxu0 %vm334_vm2, %v502_v38 }
  0x9d   : > { %v588_v40 = vpop.permute.xlu1 %587  ;;  %1362 = vmatpush1.msk.msra.mxu0 %vm334_vm2, %v501_v37  ;;  %v592_v41 = vpop.permute.xlu0 %591 }
  0x9e   : > { %v594_v42 = vsel %vm593_vm9, %v588_v40, %v590_v33  ;;  %v595_v43 = vsel %vm593_vm9, %v590_v33, %v592_v41  ;;  %1363 = vmatmul.mubr.msk.f32.vlgmr.msra.gmra.mxu0 %vm330_vm5, %v1360_v39  ;;  %1369 = vmatprep.subr.msk.mxu0 %vm334_vm2, %v1495_v2 }
  0x9f   : > { %v598_v44 = vsel %vm1524_vm4, %v594_v42, 0.0  ;;  %v599_v45 = vsel %vm1520_vm3, %v595_v43, 0.0  ;;  %1370 = vmatpush1.msk.msra.mxu0 %vm334_vm2, %v1499_v4  ;;  %757 = vmatprep.mubr.f32.mxu0 %v1432_v0 }
  0xa0   : > { %1365 = vmatprep.subr.msk.mxu1 %vm334_vm2, %v599_v45 }
  0xa1   : > { %v772_v48 = vpop.permute.xlu1 %771  ;;  %1366 = vmatpush1.msk.msra.mxu1 %vm334_vm2, %v598_v44  ;;  %v770_v49 = vpop.permute.xlu0 %769 }
  0xa2   : > { %v775_v50 = vsel %vm773_vm10, %v770_v49, %v772_v48  ;;  %1367 = vmatmul.mubr.msk.f32.vlgmr.msra.gmra.mxu1 %vm330_vm5, %v1364_v46  ;;  %1371 = vmatmul.mubr.msk.f32.vlgmr.msra.gmra.mxu0 %vm330_vm5, %v1368_v47 }
  0xa3   : > { %v779_v51 = vsel %vm1545_vm8, %v775_v50, 0.0  ;;  %855 = vmatprep.mubr.f32.mxu1 %v1432_v0  ;;  %952 = vmatprep.mubr.f32.mxu0 %v1432_v0 }
  0xa4   : > { %1373 = vmatprep.subr.msk.mxu1 %vm334_vm2, %v779_v51 }
  0xa5   : > { %v867_v52 = vpop.permute.xlu1 %866  ;;  %v768_v53 = vpop.permute.xlu0 %767 }
  0xa6   : > { %v774_v54 = vsel %vm773_vm10, %v768_v53, %v770_v49 }
  0xa7   : > { %v778_v56 = vsel %vm1541_vm7, %v774_v54, 0.0  ;;  %v1165_v54 = vld [vmem:[%s1653_s3] sm:$0xff] }
  0xa8   : > { %1374 = vmatpush1.msk.msra.mxu1 %vm334_vm2, %v778_v56 }
  0xa9   : > { %v865_v57 = vpop.permute.xlu1 %864  ;;  %v869_v58 = vpop.permute.xlu0 %868  ;;  %1375 = vmatmul.mubr.msk.f32.vlgmr.msra.gmra.mxu1 %vm330_vm5, %v1372_v55 }
  0xaa   : > { %v871_v59 = vsel %vm870_vm11, %v865_v57, %v867_v52  ;;  %v872_v60 = vsel %vm870_vm11, %v867_v52, %v869_v58  ;;  %1043 = vmatprep.mubr.f32.mxu1 %v1432_v0  ;;  %v1166_v57 = vld [vmem:[%s1653_s3 + $0x8] sm:$0x3] }
  0xab   : > { %v875_v61 = vsel %vm1524_vm4, %v871_v59, 0.0  ;;  %v876_v62 = vsel %vm1520_vm3, %v872_v60, 0.0  ;;  %v1168_v58 = vld [vmem:[%s1654_s4 + $0x8] sm:$0x3]  ;;  %v1167_v60 = vld [vmem:[%s1654_s4] sm:$0xff] }
  0xac   : > { %1377 = vmatprep.subr.msk.mxu0 %vm334_vm2, %v876_v62 }
  0xad   : > { %v968_v1 = vpop.permute.xlu1 %967  ;;  %1378 = vmatpush1.msk.msra.mxu0 %vm334_vm2, %v875_v61  ;;  %v966_v2 = vpop.permute.xlu0 %965 }
  0xae   : > { %v971_v3 = vsel %vm969_vm12, %v966_v2, %v968_v1  ;;  %1379 = vmatmul.mubr.msk.f32.vlgmr.msra.gmra.mxu0 %vm330_vm5, %v1376_v63 }
  0xaf   : > { %1381 = vmatprep.subr.msk.mxu1 %vm334_vm2, %v971_v3  ;;  %1140 = vmatprep.mubr.f32.mxu0 %v1432_v0 }
  0xb1   : > { %v1055_v4 = vpop.permute.xlu1 %1054  ;;  %v964_v5 = vpop.permute.xlu0 %963 }
  0xb2   : > { %v970_v7 = vsel %vm969_vm12, %v964_v5, %v966_v2 }
  0xb3   : > { %1382 = vmatpush1.msk.msra.mxu1 %vm334_vm2, %v970_v7 }
  0xb4   : > { %1383 = vmatmul.mubr.msk.f32.vlgmr.msra.gmra.mxu1 %vm330_vm5, %v1380_v6 }
  0xb5   : > { %v1053_v8 = vpop.permute.xlu1 %1052  ;;  %v1057_v9 = vpop.permute.xlu0 %1056  ;;  %1400 = vmatprep.mubr.msk.f32.mxu1 %vm1169_vm14, %v1165_v54 }
  0xb6   : > { %v1059_v10 = vsel %vm1058_vm13, %v1053_v8, %v1055_v4  ;;  %v1060_v11 = vsel %vm1058_vm13, %v1055_v4, %v1057_v9 }
  0xb7   : > { %v1063_v12 = vsel %vm1541_vm7, %v1059_v10, 0.0  ;;  %v1064_v0 = vsel %vm1545_vm8, %v1060_v11, 0.0 }
  0xb8   : > { %1385 = vmatprep.subr.msk.mxu0 %vm334_vm2, %v1064_v0 }
  0xb9   : > { %1386 = vmatpush1.msk.msra.mxu0 %vm334_vm2, %v1063_v12 }
  0xba   : > { %1387 = vmatmul.mubr.msk.f32.vlgmr.msra.gmra.mxu0 %vm330_vm5, %v1384_v13 }
  0xc2   : > { %v1153_v44 = vpop.permute.xlu0 %1152 }
 0x159   : > { %v405_v14 = vpop.f32.mrf.mxu0 }
 0x15a   : > { %v485_v16 = vpop.f32.mrf.mxu1 }
 0x15b   : > { %v407_v15 = vpop.f32.mrf.mxu0  ;;  %v486_v19 = vadd.f32 %v485_v16, %v405_v14 }
 0x15c   : > { %v487_v17 = vpop.f32.mrf.mxu1 }
 0x15d   : > { %v488_v20 = vadd.f32 %v487_v17, %v407_v15 }
 0x15e   : > { %v580_v18 = vpop.f32.mrf.mxu0 }
 0x15f   : > { %v585_v23 = vadd.f32 %v580_v18, %v486_v19 }
 0x160   : > { %v582_v21 = vpop.f32.mrf.mxu0 }
 0x161   : > { %v586_v24 = vadd.f32 %v582_v21, %v488_v20 }
 0x162   : > { %v677_v22 = vpop.f32.mrf.mxu1  ;;  %v759_v26 = vpop.f32.mrf.mxu0 }
 0x163   : > { %v682_v27 = vadd.f32 %v677_v22, %v585_v23 }
 0x164   : > { %v679_v25 = vpop.f32.mrf.mxu1  ;;  %v761_v29 = vpop.f32.mrf.mxu0 }
 0x165   : > { %v683_v28 = vadd.f32 %v679_v25, %v586_v24  ;;  %v764_v31 = vadd.f32 %v759_v26, %v682_v27 }
 0x167   : > { %v765_v32 = vadd.f32 %v761_v29, %v683_v28 }
 0x169   : > { %v857_v30 = vpop.f32.mrf.mxu1 }
 0x16a   : > { %v862_v35 = vadd.f32 %v857_v30, %v764_v31 }
 0x16b   : > { %v859_v33 = vpop.f32.mrf.mxu1 }
 0x16c   : > { %v863_v36 = vadd.f32 %v859_v33, %v765_v32 }
 0x16e   : > { %v954_v34 = vpop.f32.mrf.mxu0 }
 0x16f   : > { %v959_v39 = vadd.f32 %v954_v34, %v862_v35 }
 0x170   : > { %v956_v37 = vpop.f32.mrf.mxu0 }
 0x171   : > { %v960_v40 = vadd.f32 %v956_v37, %v863_v36 }
 0x174   : > { %v1045_v38 = vpop.f32.mrf.mxu1 }
 0x175   : > { %v1050_v42 = vadd.f32 %v1045_v38, %v959_v39 }
 0x176   : > { %v1047_v41 = vpop.f32.mrf.mxu1 }
 0x177   : > { %v1051_v45 = vadd.f32 %v1047_v41, %v960_v40 }
 0x17a   : > { %v1142_v43 = vpop.f32.mrf.mxu0 }
 0x17b   : > { %v1147_v46 = vadd.f32 %v1142_v43, %v1050_v42 }
 0x17c   : > { %v1144_v47 = vpop.f32.mrf.mxu0 }
 0x17d   : > { %v1148_v48 = vadd.f32 %v1144_v47, %v1051_v45  ;;  %v1155_v49 = vadd.f32 %v1153_v44, %v1147_v46 }
 0x17f   : > { %v1156_v50 = vadd.f32 %v1153_v44, %v1148_v48  ;;  %v1157_v51 = vmax.f32 %v1155_v49, 0.0 }
 0x181   : > { %v1158_v52 = vmax.f32 %v1156_v50, 0.0  ;;  %1159 = vst [vmem:[%s259_s12] sm:$0xff] %v1157_v51 }
 0x183   : > { %1160 = vst [vmem:[%s259_s12 + $0x8] sm:$0xff] %v1158_v52  ;;  %v1161_v53 = vadd.f32 %v1158_v52, %v1157_v51 }
 0x185   : > { %1162 = vadd.xlane.f32.xlu1 %v1161_v53 }
 0x20e   : > { %v1163_v55 = vpop.xlane.xlu1 %1162 }
 0x20f   : > { %v1164_v56 = vmul.f32 0.00390625, %v1163_v55 }
 0x211   : > { %1398 = vmatprep.subr.mxu1 %v1164_v56 }
 0x212   : > { %1399 = vmatpush3.msra.mxu1 %v1164_v56 }
 0x213   : > { %1401 = vmatmul.mubr.msk.f32.vlgmr.msra.gmra.mxu1 %vm1169_vm14, %v1166_v57 }
 0x2d3   : > { %v1402_v59 = vpop.f32.mrf.mxu1 }
 0x2d4   : > { %v1248_v61 = vadd.f32 %v1402_v59, %v1168_v58 }
 0x2d5   : > { %v1242_v62 = vpop.f32.mrf.mxu1 }
 0x2d6   : > { %1253 = vst.msk [vmem:[%s264_s20 + $0x8] sm:$0x3] %vm1252_vm15, %v1248_v61  ;;  %v1243_v63 = vadd.f32 %v1242_v62, %v1167_v60 }
 0x2d8   : > { %1251 = vst.msk [vmem:[%s264_s20] sm:$0xff] %vm593_vm9, %v1243_v63 }
 0x2d9 PF: > { %s17_s21 = sadd.s32 1, %s1430_s21  }
 0x2da   : > { %p14_p4 = scmp.ge.s32.totalorder %s17_s21, 4  }
 0x2dc   :  { %16 = sbr.rel (!%p14_p4) target bundleno = 1 (0x1), region = 90 }

</bundles_post_ra>
